<compile_context>
chip_gen: v6e
topology: v6e:2x2x1
jax: 0.10.0
libtpu: 0.0.40
codegen_flags: <defaults>
</compile_context>

<pallas_src>
import functools
import math

import jax
import jax.numpy as jnp
from jax.experimental import pallas as pl
from jax.experimental.pallas import tpu as pltpu


# ---------------------------------------------------------------------------
# Tiling / budget helpers
# ---------------------------------------------------------------------------
def _device_budgets():
    """(target bytes per streamed tile, physical VMEM capacity) for this chip."""
    vmem_cap = 128 * 1024 * 1024
    try:
        vmem_cap = int(pltpu.get_tpu_info().vmem_capacity_bytes)
    except Exception:
        pass
    # v5e / v6e: 128 MiB physical VMEM -> ~6 MiB tiles.
    # v7x: 64 MiB per TensorCore -> ~4 MiB tiles.
    if vmem_cap >= 128 * 1024 * 1024:
        target_tile = 6 * 1024 * 1024
    else:
        target_tile = 4 * 1024 * 1024
    return target_tile, vmem_cap


def _vmem_limit(working_set_bytes, vmem_cap):
    """Scoped-VMEM limit sized from the actual working set (+headroom)."""
    return int(min(max(working_set_bytes + 6 * 1024 * 1024, 16 * 1024 * 1024),
                   max(vmem_cap // 2, 32 * 1024 * 1024)))


def _pick_lane_layout(n, align=None):
    """Flatten n elements to (rows, lane) with a lane-dense last dim.

    Returns (rows, lane, padded_n). If `align` is given, prefer a lane width
    dividing it (keeps channel boundaries on row boundaries for in-kernel bias).
    """
    candidates = (2048, 1024, 512, 256, 128)
    if align is not None:
        for lane in candidates:
            if align % lane == 0 and n % lane == 0:
                return n // lane, lane, n
    for lane in candidates:
        if n % lane == 0:
            return n // lane, lane, n
    # Awkward sizes: pad the flattened array to a lane-dense multiple (padded
    # elements are inert and sliced off in the wrapper). One-time pad copy is
    # far cheaper than masked lane-sparse stores on every pass.
    lane = 1024 if n >= 1024 else 128
    padded = -(-n // lane) * lane
    return padded // lane, lane, padded


def _choose_row_tile(num_rows, row_bytes, target_bytes):
    """Largest row tile (multiple of 8 or full extent) within the tile budget."""
    max_rows = max(8, target_bytes // max(row_bytes, 1))
    if num_rows >= 16:
        # Keep >= 2 row tiles so the "parallel" grid axis can shard across both
        # TensorCores on v7x (one extra ~0.35us step on single-TC chips).
        half = max(8, ((num_rows // 2 + 7) // 8) * 8)
        max_rows = min(max_rows, half)
    if num_rows <= max_rows:
        return num_rows                       # full extent -> always a legal block dim
    tile = max(8, (max_rows // 8) * 8)
    # Bounded divisor search: only accept divisors >= tile/2. Otherwise keep
    # the big tile and accept one masked ragged edge block — never collapse to
    # thousands of tiny tiles for awkward row counts (e.g. R = 8*prime).
    lo = max(8, ((tile // 2 + 7) // 8) * 8)
    t = tile
    while t >= lo:
        if num_rows % t == 0:
            return t
        t -= 8
    return tile                               # ragged edge tile (masked sublane writes)


# ---------------------------------------------------------------------------
# SNN mode (T > 0): integrate-and-fire with reset-by-subtraction.
#   mem_0 = 0.5 * thresh
#   mem_t = mem_{t-1} - bias_t + x_t
#   spike_t = (mem_t >= thresh) * thresh      (ZIF.forward * thresh)
#   mem_t  -= spike_t
# ---------------------------------------------------------------------------
def _if_snn_kernel(thresh_ref, *refs, has_bias):
    if has_bias:
        x_ref, bias_ref, spike_ref, mem_ref = refs
    else:
        x_ref, spike_ref, mem_ref = refs
    t = pl.program_id(1)                      # temporal axis is innermost ("arbitrary")
    thre = thresh_ref[0]

    @pl.when(t == 0)
    def _init():
        mem_ref[...] = jnp.broadcast_to(0.5 * thre, mem_ref.shape).astype(mem_ref.dtype)

    mem = mem_ref[...]
    if has_bias:
        mem = mem - bias_ref[...].astype(jnp.float32)   # (TILE_R, 1) broadcasts over lanes
    mem = mem + x_ref[...].astype(jnp.float32)
    spike = jnp.where(mem >= thre, thre, 0.0)
    mem_ref[...] = mem - spike
    spike_ref[...] = spike.astype(spike_ref.dtype)


def if_forward_snn(x, thresh, T, time_based_bias=None, spike_dtype=None):
    """x: [T*B, ...]; thresh: (1,) f32; time_based_bias: (T, C) f32 or None.

    spike_dtype: optional narrower output dtype (spikes are exactly {0, thresh},
    so bf16 is lossless for representable thresholds and cuts HBM write traffic).
    """
    TB = x.shape[0]
    assert TB % T == 0, "leading dim must be T*B"
    B = TB // T
    inner_shape = x.shape[1:]
    n = B * math.prod(inner_shape)
    out_dtype = jnp.dtype(spike_dtype) if spike_dtype is not None else x.dtype

    C = inner_shape[0] if len(inner_shape) >= 1 else 1
    spatial = math.prod(inner_shape[1:]) if len(inner_shape) > 1 else 1
    align = spatial if time_based_bias is not None else None

    R, LANE, n_pad = _pick_lane_layout(n, align=align)

    x2 = x.reshape(T, n)
    row_bias = None
    if time_based_bias is not None:
        assert time_based_bias.shape == (T, C)
        if spatial % LANE == 0:
            # Each (R, LANE) row belongs to a single channel: stream a tiny
            # per-row bias column into the kernel (no extra full-tensor HBM pass).
            rows_per_c = spatial // LANE
            ch = (jnp.arange(R, dtype=jnp.int32) // rows_per_c) % C
            row_bias = jnp.take(time_based_bias.astype(jnp.float32), ch, axis=1)[..., None]
        else:
            # TODO(synk): lane width does not align with channel boundaries for
            # this shape; fall back to a one-time wrapper fold (one extra HBM
            # pass on this path only).
            b = time_based_bias.astype(x.dtype).reshape((T, 1, C) + (1,) * (x.ndim - 2))
            x2 = (x.reshape((T, B) + inner_shape) - b).reshape(T, n)

    if n_pad != n:
        x2 = jnp.pad(x2, ((0, 0), (0, n_pad - n)))     # padded elements are inert
    x3 = x2.reshape(T, R, LANE)

    target_tile, vmem_cap = _device_budgets()
    TILE_R = _choose_row_tile(R, LANE * x3.dtype.itemsize, target_tile)
    grid = (pl.cdiv(R, TILE_R), T)

    in_specs = [
        pl.BlockSpec(memory_space=pltpu.MemorySpace.SMEM),            # thresh (1,)
        pl.BlockSpec((None, TILE_R, LANE), lambda r, t: (t, r, 0)),   # x_t row tile
    ]
    args = [thresh, x3]
    if row_bias is not None:
        in_specs.append(pl.BlockSpec((None, TILE_R, 1), lambda r, t: (t, r, 0)))
        args.append(row_bias)

    tile_in = TILE_R * LANE * x3.dtype.itemsize
    tile_out = TILE_R * LANE * jnp.dtype(out_dtype).itemsize
    ws = 2 * tile_in + 2 * tile_out + TILE_R * LANE * 4               # f32 membrane
    if row_bias is not None:
        ws += 2 * TILE_R * 128 * 4                                    # tiny bias buffers

    out = pl.pallas_call(
        functools.partial(_if_snn_kernel, has_bias=row_bias is not None),
        out_shape=jax.ShapeDtypeStruct((T, R, LANE), out_dtype),
        grid_spec=pltpu.PrefetchScalarGridSpec(
            num_scalar_prefetch=0,
            grid=grid,
            in_specs=in_specs,
            out_specs=pl.BlockSpec((None, TILE_R, LANE), lambda r, t: (t, r, 0)),
            scratch_shapes=[pltpu.VMEM((TILE_R, LANE), jnp.float32)],  # membrane
        ),
        compiler_params=pltpu.CompilerParams(
            dimension_semantics=("parallel", "arbitrary"),
            vmem_limit_bytes=_vmem_limit(ws, vmem_cap)),
    )(*args)

    out = out.reshape(T, n_pad)
    if n_pad != n:
        out = out[:, :n]
    # MergeTemporalDim: [T, B, ...] -> [T*B, ...]
    return out.reshape((TB,) + inner_shape)


# ---------------------------------------------------------------------------
# QCFS mode (T == 0): x = floor(clamp(x/thresh, 0, 1) * L + 0.5) / L * thresh
# (kept op-for-op with the reference; divides are hidden under DMA)
# ---------------------------------------------------------------------------
def _if_qcfs_kernel(thresh_ref, x_ref, o_ref, *, L):
    thre = thresh_ref[0]
    y = jnp.clip(x_ref[...].astype(jnp.float32) / thre, 0.0, 1.0)
    y = jnp.floor(y * L + 0.5) / L
    o_ref[...] = (y * thre).astype(o_ref.dtype)


def if_forward_qcfs(x, thresh, L):
    """x: any shape; thresh: (1,) f32."""
    shape = x.shape
    n = math.prod(shape)
    R, LANE, n_pad = _pick_lane_layout(n)

    x1 = x.reshape(n)
    if n_pad != n:
        x1 = jnp.pad(x1, (0, n_pad - n))
    x2 = x1.reshape(R, LANE)

    target_tile, vmem_cap = _device_budgets()
    TILE_R = _choose_row_tile(R, LANE * x2.dtype.itemsize, target_tile)
    grid = (pl.cdiv(R, TILE_R),)
    ws = 4 * TILE_R * LANE * x2.dtype.itemsize        # 2x input + 2x output buffers

    out = pl.pallas_call(
        functools.partial(_if_qcfs_kernel, L=float(L)),
        out_shape=jax.ShapeDtypeStruct((R, LANE), x.dtype),
        grid_spec=pltpu.PrefetchScalarGridSpec(
            num_scalar_prefetch=0,
            grid=grid,
            in_specs=[
                pl.BlockSpec(memory_space=pltpu.MemorySpace.SMEM),   # thresh (1,)
                pl.BlockSpec((TILE_R, LANE), lambda i: (i, 0)),
            ],
            out_specs=pl.BlockSpec((TILE_R, LANE), lambda i: (i, 0)),
        ),
        compiler_params=pltpu.CompilerParams(
            dimension_semantics=("parallel",),
            vmem_limit_bytes=_vmem_limit(ws, vmem_cap)),
    )(thresh, x2)

    out = out.reshape(n_pad)
    if n_pad != n:
        out = out[:n]
    return out.reshape(shape)


# ---------------------------------------------------------------------------
# Module-like wrapper mirroring IF.__init__ / IF.forward
# ---------------------------------------------------------------------------
class IFPallas:
    def __init__(self, T=0, L=8, thresh=8.0, tau=1.0, gama=1.0,
                 time_based_bias=None, spike_dtype=None):
        self.T = T
        self.L = L
        self.tau = tau
        self.gama = gama
        # nn.Parameter(torch.tensor([thresh]))
        self.thresh = jnp.array([thresh], dtype=jnp.float32)
        # The reference module lazily creates all-zero time_based_bias (a no-op).
        # None here means "zero bias" and skips all bias work.
        self.time_based_bias = time_based_bias   # (T, C) array or None
        self.spike_dtype = spike_dtype            # optional narrower spike dtype

    def __call__(self, x):
        if self.T > 0:
            return if_forward_snn(x, self.thresh, self.T,
                                  self.time_based_bias, self.spike_dtype)
        return if_forward_qcfs(x, self.thresh, self.L)


# ---------------------------------------------------------------------------
# Pure-JAX references for verification
# ---------------------------------------------------------------------------
def ref_snn(x, thresh, bias, T):
    B = x.shape[0] // T
    xs = x.reshape((T, B) + x.shape[1:]).astype(jnp.float32)
    thre = thresh[0]
    bias_b = bias.astype(jnp.float32).reshape((T, 1, bias.shape[1]) + (1,) * (x.ndim - 2))
    mem = 0.5 * thre
    spikes = []
    for t in range(T):
        mem = mem - bias_b[t]
        mem = mem + xs[t]
        spike = jnp.where(mem >= thre, thre, 0.0)   # == (mem - thre >= 0) * thre
        mem = mem - spike
        spikes.append(spike)
    return jnp.stack(spikes, 0).reshape(x.shape).astype(x.dtype)


def ref_qcfs(x, thresh, L):
    thre = thresh[0]
    y = jnp.clip(x / thre, 0.0, 1.0)
    y = jnp.floor(y * L + 0.5) / L
    return (y * thre).astype(x.dtype)


# TODO(synk): ZIF / GradFloor custom surrogate gradients (backward) are not
# implemented; only the forward pass is translated.

if __name__ == "__main__":
    key = jax.random.PRNGKey(0)
    k1, k2, k3, k4, k5 = jax.random.split(key, 5)

    T, B, C, H, W = 4, 2, 4, 16, 16

    # --- SNN mode (T > 0), zero bias (the module's actual behavior) ---
    x_snn = jax.random.normal(k1, (T * B, C, H, W), jnp.float32) * 6.0 + 2.0
    if_snn = IFPallas(T=T, L=8, thresh=8.0)
    y_snn = jax.block_until_ready(if_snn(x_snn))
    y_snn_ref = ref_snn(x_snn, if_snn.thresh, jnp.zeros((T, C), jnp.float32), T)
    assert y_snn.shape == x_snn.shape
    assert jnp.allclose(y_snn, y_snn_ref, atol=1e-5), "SNN (zero-bias) path mismatch"

    # --- SNN mode with a nonzero per-timestep/per-channel bias (in-kernel bias) ---
    bias = jax.random.normal(k3, (T, C), jnp.float32) * 0.5
    if_snn_b = IFPallas(T=T, L=8, thresh=8.0, time_based_bias=bias)
    y_b = jax.block_until_ready(if_snn_b(x_snn))
    y_b_ref = ref_snn(x_snn, if_snn_b.thresh, bias, T)
    assert jnp.allclose(y_b, y_b_ref, atol=1e-5), "SNN (bias) path mismatch"

    # --- SNN mode with an awkward (non-128-multiple) activation -> padded layout ---
    Ta = 3
    x_awk = jax.random.normal(k4, (Ta * 2, 3, 5, 5), jnp.float32) * 6.0 + 2.0
    if_awk = IFPallas(T=Ta, L=8, thresh=8.0)
    y_awk = jax.block_until_ready(if_awk(x_awk))
    y_awk_ref = ref_snn(x_awk, if_awk.thresh, jnp.zeros((Ta, 3), jnp.float32), Ta)
    assert jnp.allclose(y_awk, y_awk_ref, atol=1e-5), "SNN (padded) path mismatch"

    # --- QCFS mode (T == 0) ---
    x_q = jax.random.normal(k2, (B, C, H, W), jnp.float32) * 5.0
    if_q = IFPallas(T=0, L=8, thresh=8.0)
    y_q = jax.block_until_ready(if_q(x_q))
    y_q_ref = ref_qcfs(x_q, if_q.thresh, if_q.L)
    assert y_q.shape == x_q.shape
    assert jnp.allclose(y_q, y_q_ref, atol=1e-5), "QCFS path mismatch"

    # --- QCFS mode with an awkward shape -> padded layout ---
    x_q2 = jax.random.normal(k5, (2, 3, 5, 7), jnp.float32) * 5.0
    y_q2 = jax.block_until_ready(if_q(x_q2))
    y_q2_ref = ref_qcfs(x_q2, if_q.thresh, if_q.L)
    assert jnp.allclose(y_q2, y_q2_ref, atol=1e-5), "QCFS (padded) path mismatch"

    print("KERNEL_OK")
</pallas_src>

<mosaic_0001>
module attributes {stable_mosaic.version = 11 : i64} {
  func.func @_if_snn_kernel(%arg0: i32, %arg1: i32, %arg2: memref<1xf32, #tpu.memory_space<smem>>, %arg3: memref<1x1x2048xf32, #tpu.memory_space<vmem>>, %arg4: memref<1x1x2048xf32, #tpu.memory_space<vmem>>, %arg5: memref<1x2048xf32, #tpu.memory_space<vmem>>) attributes {dimension_semantics = [#tpu.dimension_semantics<parallel>, #tpu.dimension_semantics<arbitrary>], iteration_bounds = array<i64: 1, 4>, scalar_prefetch = 0 : i64, scratch_operands = 1 : i64, tpu.core_type = #tpu.core_type<tc>, window_params = [{transform_indices = @transform_0, window_bounds = array<i64: 1>}, {transform_indices = @transform_1, window_bounds = array<i64: 1, 1, 2048>}, {transform_indices = @transform_2, window_bounds = array<i64: 1, 1, 2048>}]} {
    %c0 = arith.constant 0 : index
    %0 = memref.load %arg2[%c0] : memref<1xf32, #tpu.memory_space<smem>>
    %c0_i32 = arith.constant 0 : i32
    %1 = arith.cmpi eq, %arg1, %c0_i32 : i32
    %2 = arith.extui %1 : i1 to i32
    %c0_i32_0 = arith.constant 0 : i32
    %3 = arith.cmpi ne, %2, %c0_i32_0 : i32
    scf.if %3 {
      %cst_11 = arith.constant 5.000000e-01 : f32
      %18 = arith.mulf %cst_11, %0 : f32
      %19 = vector.broadcast %18 : f32 to vector<1x2048xf32>
      %c0_12 = arith.constant 0 : index
      %c0_13 = arith.constant 0 : index
      %20 = vector.load %arg5[%c0_12, %c0_13] : memref<1x2048xf32, #tpu.memory_space<vmem>>, vector<1x2048xf32>
      tpu.vector_store %arg5[%c0_12, %c0_13], %19 {strides = array<i32>} : memref<1x2048xf32, #tpu.memory_space<vmem>>, vector<1x2048xf32>,
    } else {
    }
    %c0_1 = arith.constant 0 : index
    %c0_2 = arith.constant 0 : index
    %4 = vector.load %arg5[%c0_1, %c0_2] : memref<1x2048xf32, #tpu.memory_space<vmem>>, vector<1x2048xf32>
    %c0_3 = arith.constant 0 : index
    %c0_4 = arith.constant 0 : index
    %c0_5 = arith.constant 0 : index
    %5 = vector.load %arg3[%c0_3, %c0_4, %c0_5] : memref<1x1x2048xf32, #tpu.memory_space<vmem>>, vector<1x1x2048xf32>
    %6 = vector.shape_cast %5 : vector<1x1x2048xf32> to vector<1x2048xf32>
    %7 = arith.addf %4, %6 : vector<1x2048xf32>
    %8 = vector.broadcast %0 : f32 to vector<1x2048xf32>
    %9 = arith.cmpf oge, %7, %8 : vector<1x2048xf32>
    %cst = arith.constant 0.000000e+00 : f32
    %10 = vector.broadcast %0 : f32 to vector<1x2048xf32>
    %11 = vector.broadcast %cst : f32 to vector<1x2048xf32>
    %12 = arith.select %9, %10, %11 : vector<1x2048xi1>, vector<1x2048xf32>
    %13 = arith.subf %7, %12 : vector<1x2048xf32>
    %c0_6 = arith.constant 0 : index
    %c0_7 = arith.constant 0 : index
    %14 = vector.load %arg5[%c0_6, %c0_7] : memref<1x2048xf32, #tpu.memory_space<vmem>>, vector<1x2048xf32>
    tpu.vector_store %arg5[%c0_6, %c0_7], %13 {strides = array<i32>} : memref<1x2048xf32, #tpu.memory_space<vmem>>, vector<1x2048xf32>,
    %c0_8 = arith.constant 0 : index
    %c0_9 = arith.constant 0 : index
    %c0_10 = arith.constant 0 : index
    %15 = vector.load %arg4[%c0_8, %c0_9, %c0_10] : memref<1x1x2048xf32, #tpu.memory_space<vmem>>, vector<1x1x2048xf32>
    %16 = vector.shape_cast %15 : vector<1x1x2048xf32> to vector<1x2048xf32>
    %17 = vector.shape_cast %12 : vector<1x2048xf32> to vector<1x1x2048xf32>
    tpu.vector_store %arg4[%c0_8, %c0_9, %c0_10], %17 {strides = array<i32>} : memref<1x1x2048xf32, #tpu.memory_space<vmem>>, vector<1x1x2048xf32>,
    return
  }
  func.func @transform_0(%arg0: i32, %arg1: i32) -> i32 {
    %c0_i32 = arith.constant 0 : i32
    %c0_i32_0 = arith.constant 0 : i32
    return %c0_i32 : i32
  }
  func.func @transform_1(%arg0: i32, %arg1: i32) -> (i32, i32, i32) {
    %c0_i32 = arith.constant 0 : i32
    %c0_i32_0 = arith.constant 0 : i32
    return %arg1, %arg0, %c0_i32 : i32, i32, i32
  }
  func.func @transform_2(%arg0: i32, %arg1: i32) -> (i32, i32, i32) {
    %c0_i32 = arith.constant 0 : i32
    %c0_i32_0 = arith.constant 0 : i32
    return %arg1, %arg0, %c0_i32 : i32, i32, i32
  }
}

</mosaic_0001>

<bundles_post_ra>
// kernel: tpu_custom_call.1
= control target key start
LH: loop header
LB: loop body
LE: loop exit
PB: predicated region body
PF: predicated region fallthrough
CT: control target
= control target key end

     0   :  { %s661_s0 = inlined_call_operand.<no memory space> [shape: f32[1], index: 0, kind: input, shape index: {}]   ;;  %s662_s1 = inlined_call_operand.hbm [shape: f32[4,1,2048], index: 1, kind: input, shape index: {}]   ;;  %s663_s2 = inlined_call_operand.hbm [shape: f32[4,1,2048], index: 2, kind: output, shape index: {}]  }
   0x1   :  { %7 = sst [smem:[#allocation3]] %s661_s0 }
   0x2   :  { %8 = vsyncpa [#allocation5], 0 }
   0x3   :  { %10 = vsyncpa [#allocation5 + $0x1], 0 }
   0x4   :  { %11 = vsyncpa [#allocation6], 0 }
   0x5   :  { %13 = vsyncpa [#allocation6 + $0x1], 0  ;;  %s516_s11 = smov 0   ;;  %s518_s12 = smov 0  }
   0x6   :  { %s520_s13 = smov 0   ;;  %s522_s14 = smov 0  }
   0x7   :  { %s524_s15 = smov 0   ;;  %s526_s16 = smov 0  }
   0x8 LB: > { %s306_s0 = sadd.s32 4294967295, %s494_s16   ;;  %s307_s17 = sadd.s32 4294967294, %s494_s16   ;;  %s494_s16 = sphi %s526_s16, %s19_s16   ;;  %s490_s15 = sphi %s524_s15, %s674_s15   ;;  %s486_s14 = sphi %s522_s14, %s673_s14   ;;  %s482_s13 = sphi %s520_s13, %s672_s13   ;;  %s478_s12 = sphi %s518_s12, %s671_s12   ;;  %s474_s11 = sphi %s516_s11, %s670_s11  }
   0x9   : > { %s28_s18 = sadd.s32 1, %s490_s15  ;;  %s61_s19 = sadd.s32 1, %s482_s13 }
   0xa   : > { %p29_p0 = scmp.ge.s32.totalorder %s28_s18, 4  ;;  %p68_p1 = scmp.ne.s32.totalorder %s482_s13, %s478_s12 }
   0xb   : > { %p69_p2 = scmp.eq.s32.totalorder %s494_s16, 0  ;;  %p74_p3 = scmp.ne.s32.totalorder %s478_s12, %s474_s11 }
   0xc   : > { %s676_s18 = smov (%p29_p0, %s28_s18), 0  ;;  %p75_p5 = scmp.eq.s32.totalorder %s306_s0, 0 }
   0xd   : > { %p557_p4 = por %p69_p2, %p68_p1  ;;  %s56_s21 = ssub.s32 %s490_s15, %s676_s18 }
   0xe   : > { %p100_p6 = scmp.eq.s32.totalorder %s306_s0, 3  ;;  %p59_p7 = scmp.eq.s32.totalorder %s56_s21, 0 }
   0xf   : > { %p563_p8 = por %p75_p5, %p74_p3  ;;  %p106_p10 = scmp.eq.s32.totalorder %s307_s17, 3 }
  0x10   : > { %p567_p9 = por %p100_p6, %p68_p1  ;;  %p336_p12 = scmp.lt.s32.totalorder %s494_s16, 4 }
  0x11   : > { %s572_s24 = scalar_select %p59_p7, %s482_s13, %s61_s19  }
  0x12   : > { %p574_p11 = por %p106_p10, %p74_p3  ;;  %s129_s26 = sand.u32 1, %s482_s13  }
  0x13   : > { %s310_s27 = sshll.u32 %s129_s26, 4  ;;  %s322_s28 = sshll.u32 %s490_s15, 8 }
  0x14   : > { %s667_s25 = scalar_select %p574_p11, 1, 0 }
  0x15   : > { %s141_s3 = scalar_lea.hbm %s662_s1, %s322_s28  ;;  %s133_s4 = scalar_lea.vmem [#allocation4], %s310_s27 }
  0x16   : > { %s143_s5 = sshll.u32 %s133_s4, 4  ;;  %p586_p13 = pnand %p336_p12, %p557_p4  ;;  %s144_s5 = int_to_ptr.vmem [resolvable:$true] %s143_s5 }
  0x17   : > { %p313_p0 = scmp.ge.s32.totalorder %s494_s16, 1  ;;  %p148_p1 = scmp.lt.s32.totalorder %s494_s16, 5 }
  0x18   : > { %s130_s7 = scalar_lea.sflag [#allocation5], %s129_s26  ;;  %p388_p2 = pneg %p586_p13 }
  0x19   : > { %s399_s8 = scalar_lea.vmem %s144_s5, 256  ;;  %s496_s9 = smov [#allocation4]  }
  0x1a   : > { %p400_p3 = scmp.ne.s32.totalorder %s144_s5, %s399_s8  ;;  %s404_s10 = sshll.u32 %s496_s9, 4  ;;  %s405_s10 = int_to_ptr.vmem [resolvable:$false] %s404_s10 }
  0x1b   : > { %s406_s0 = scalar_lea.vmem %s405_s10, 512  ;;  %p407_p7 = scmp.lt.s32.totalorder %s144_s5, %s405_s10 }
  0x1c   : > { %p402_p5 = pnand %p400_p3, %p388_p2  ;;  %p408_p10 = scmp.lt.s32.totalorder %s406_s0, %s399_s8 }
  0x1e   : > { %p403_p6 = pneg %p402_p5  ;;  %p409_p4 = por %p408_p10, %p407_p7 }
  0x20   : > { %p410_p12 = pnand %p409_p4, %p403_p6 }
  0x22   : > { %413 = shalt.err (!%p410_p12)
}
  0x23   : > { %331 = dma.hbm_to_vmem [thread:$0]  (!%p586_p13), %s141_s3, 256, %s144_s5, %s130_s7  }
  0x24   : > { %p149_p11 = pnand %p313_p0, %p148_p1 }
  0x25   : > { %s601_s17 = sand.u32 (!%p149_p11), 1, %s478_s12  }
  0x26   : > { %152 = sbr.rel (%p149_p11) target bundleno = 80 (0x50), region = 28  ;;  %s314_s19 = sshll.u32 (!%p149_p11), %s601_s17, 4 }
  0x27   : > { %s155_s20 = scalar_lea.sflag (!%p149_p11), [#allocation5], %s601_s17  ;;  %s158_s21 = scalar_lea.vmem (!%p149_p11), [#allocation4], %s314_s19 }
  0x2b   : > { %465 = dma.done.wait (%p563_p8), %s155_s20, 256  }
  0x2c   : > { %467 = vsyncadd (%p563_p8), %s155_s20, 4294967040  ;;  %s179_s26 = sld [smem:[#allocation3]]  ;;  %s178_s27 = scalar_lea.vmem [#allocation7], %s314_s19 }
  0x2d   : > { %p316_p13 = scmp.ne.s32.totalorder %s486_s14, 0 }
  0x2f   : > { %183 = sbr.rel (%p316_p13) target bundleno = 54 (0x36), region = 36 }
  0x32   : > { %s184_s28 = smul.f32 (!%p316_p13), 0.5, %s179_s26 }
  0x34   : > { %v185_v0 = vstv %s184_s28 }
  0x35   : > { %186 = vst [vmem:[#allocation2] sm:$0xff] %v185_v0  ;;  %187 = vst [vmem:[#allocation2 + $0x8] sm:$0xff] %v185_v0 }
  0x36 PF: > { %v190_v2 = vld [vmem:[%s158_s21] sm:$0xff]  ;;  %v194_v3 = vstv %s179_s26  ;;  %v191_v6 = vld [vmem:[%s158_s21 + $0x8] sm:$0xff]  ;;  %s323_s22 = sshll.u32 %s486_s14, 8  ;;  %s222_s29 = sshll.u32 %s178_s27, 4  ;;  %s616_s29 = int_to_ptr.vmem [resolvable:$true] %s222_s29 }
  0x37   : > { %s614_s4 = scalar_lea.hbm %s663_s2, %s323_s22  ;;  %s206_s14 = scalar_lea.sflag [#allocation6], %s601_s17 }
  0x38   : > { %s414_s5 = scalar_lea.vmem %s616_s29, 256  ;;  %s497_s6 = smov [#allocation7]  }
  0x39   : > { %p415_p8 = scmp.ne.s32.totalorder %s616_s29, %s414_s5  ;;  %s418_s7 = sshll.u32 %s497_s6, 4  ;;  %s419_s7 = int_to_ptr.vmem [resolvable:$false] %s418_s7 }
  0x3a   : > { %s420_s8 = scalar_lea.vmem %s419_s7, 512  ;;  %p421_p1 = scmp.lt.s32.totalorder %s616_s29, %s419_s7 }
  0x3b   : > { %p416_p11 = pnand %p415_p8, %p567_p9  ;;  %p422_p2 = scmp.lt.s32.totalorder %s420_s8, %s414_s5 }
  0x3c   : > { %v188_v1 = vld [vmem:[#allocation2] sm:$0xff]  ;;  %v189_v4 = vld [vmem:[#allocation2 + $0x8] sm:$0xff] }
  0x3d   : > { %v192_v5 = vadd.f32 %v190_v2, %v188_v1  ;;  %v193_v7 = vadd.f32 %v191_v6, %v189_v4  ;;  %p417_p0 = pneg %p416_p11  ;;  %p423_p3 = por %p422_p2, %p421_p1 }
  0x3f   : > { %vm195_vm0 = vcmp.ge.f32.partialorder %v192_v5, %v194_v3  ;;  %vm196_vm1 = vcmp.ge.f32.partialorder %v193_v7, %v194_v3  ;;  %p424_p5 = pnand %p423_p3, %p417_p0 }
  0x40   : > { %v197_v8 = vsel %vm195_vm0, %v194_v3, 0.0  ;;  %v198_v9 = vsel %vm196_vm1, %v194_v3, 0.0 }
  0x41   : > { %203 = vst [vmem:[%s178_s27] sm:$0xff] %v197_v8  ;;  %v199_v10 = vsub.f32 %v192_v5, %v197_v8  ;;  %204 = vst [vmem:[%s178_s27 + $0x8] sm:$0xff] %v198_v9  ;;  %v200_v11 = vsub.f32 %v193_v7, %v198_v9 }
  0x43   : > { %201 = vst [vmem:[#allocation2] sm:$0xff] %v199_v10 }
  0x44   : > { %427 = shalt.err (!%p424_p5)
}
  0x45   : > { %s428_s9 = scalar_lea.hbm %s614_s4, 256  ;;  %s432_s17 = scalar_lea.hbm %s663_s2, 1024 }
  0x46   : > { %p429_p6 = scmp.ne.s32.totalorder %s614_s4, %s428_s9  ;;  %p433_p4 = scmp.lt.s32.totalorder %s614_s4, %s663_s2 }
  0x47   : > { %p434_p12 = scmp.lt.s32.totalorder %s432_s17, %s428_s9 }
  0x48   : > { %p430_p7 = pnand %p429_p6, %p567_p9 }
  0x49   : > { %p435_p13 = por %p434_p12, %p433_p4 }
  0x4a   : > { %p431_p10 = pneg %p430_p7 }
  0x4c   : > { %p436_p8 = pnand %p435_p13, %p431_p10 }
  0x4e   : > { %439 = shalt.err (!%p436_p8)
}
  0x4f   : > { %326 = dma.vmem_to_hbm [thread:$0]  (%p567_p9), %s616_s29, 256, %s614_s4, %s206_s14   ;;  %202 = vst [vmem:[#allocation2 + $0x8] sm:$0xff] %v200_v11 }
  0x50 PF: > { %p337_p11 = scmp.ge.s32.totalorder %s494_s16, 2  ;;  %s234_s21 = sand.u32 1, %s474_s11  }
  0x51   : > { %p669_p0 = scmp.ne.s32.totalorder %s667_s25, 0  ;;  %s235_s26 = scalar_lea.sflag [#allocation6], %s234_s21 }
  0x53   : > { %p333_p1 = pnand %p337_p11, %p669_p0 }
  0x55   : > { %p334_p2 = pneg %p333_p1 }
  0x57   : > { %469 = dma.done.wait (%p334_p2), %s235_s26, 256  }
  0x58   : > { %471 = vsyncadd (%p334_p2), %s235_s26, 4294967040  ;;  %s19_s16 = sadd.s32 1, %s494_s16   ;;  %s670_s11 = smov %s478_s12 }
  0x59   : > { %p16_p3 = scmp.ge.s32.totalorder %s19_s16, 6   ;;  %s671_s12 = smov %s482_s13 }
  0x5a   : > { %s672_s13 = smov %s572_s24  ;;  %s673_s14 = smov %s490_s15 }
  0x5b   : > { %s674_s15 = smov %s676_s18  ;;  %18 = sbr.rel (!%p16_p3) target bundleno = 8 (0x8), region = 77 }
  0x60   :  { %240 = vsyncpa [#allocation5], 1 }
  0x61   :  { %242 = vsyncpa [#allocation5 + $0x1], 1 }
  0x62   :  { %243 = vsyncpa [#allocation6], 1 }
  0x63   :  { %245 = vsyncpa [#allocation6 + $0x1], 1 }

</bundles_post_ra>
